<compile_context>
chip_gen: v5e
topology: v5e:2x2
jax: 0.10.0
libtpu: 0.0.40
codegen_flags: <defaults>
</compile_context>

<pallas_src>
import jax
import jax.numpy as jnp
from jax import lax
from jax.experimental import pallas as pl
from jax.experimental.pallas import tpu as pltpu

DIMS = [19, 30, 30, 30, 25, 15, 10, 3]
NUM_LAYERS = len(DIMS) - 1          # 7
IN_DIM = DIMS[0]                    # 19
OUT_DIM = DIMS[-1]                  # 3
FEAT_PAD = 32                       # every feature dim padded to 32 sublanes
LANE = 128                          # batch-tile granularity (lane width)


def _round_up(x, m):
    return ((x + m - 1) // m) * m


def mlp_kernel(x_ref, w_ref, b_ref, o_ref):
    """x_ref: (32, TILE_B) f32   w_ref: (7, 32, 32) [W^T per layer, bf16/f32]
       b_ref: (7, 32, 1) f32     o_ref: (32, TILE_B) f32  (batch on lanes)."""
    w_dtype = w_ref.dtype
    b_all = b_ref[...]                                # (7, 32, 1) f32, loaded once
    h = x_ref[...].astype(w_dtype)                    # activations in weight dtype

    for l in range(NUM_LAYERS):
        # z[f_out, b] = sum_f_in Wt[f_out, f_in] * h[f_in, b]; f32 accumulation.
        z = jnp.dot(w_ref[l], h, preferred_element_type=jnp.float32)
        z = z + b_all[l]                              # (32,1) lane-broadcast, f32
        if l < NUM_LAYERS - 1:
            h = jnp.maximum(z, 0.0).astype(w_dtype)   # ReLU in f32, carry bf16
        else:
            h = z                                     # final layer: no ReLU

    o_ref[...] = h.astype(o_ref.dtype)                # full 32-row lane-dense store


def pack_params(params, param_dtype=jnp.bfloat16):
    """Pack 7 (W_in_out, b) pairs into transposed, padded slabs.

    Weight slab: (7, 32, 32); layer l holds W_l^T at [l, :out_l, :in_l], zeros
    elsewhere.  Bias slab: (7, 32, 1) f32; layer l at [l, :out_l, 0].
    """
    w_slab = jnp.zeros((NUM_LAYERS, FEAT_PAD, FEAT_PAD), jnp.float32)
    b_slab = jnp.zeros((NUM_LAYERS, FEAT_PAD, 1), jnp.float32)
    for l, (w, b) in enumerate(params):
        wt = w.astype(jnp.float32).T                  # (out_l, in_l)
        w_slab = w_slab.at[l, :wt.shape[0], :wt.shape[1]].set(wt)
        b_slab = b_slab.at[l, :b.shape[0], 0].set(b.astype(jnp.float32))
    return w_slab.astype(param_dtype), b_slab


def perceptron_forward(x, w_slab, b_slab, *, tile_b=1024):
    """x: (B, 19) f32. w_slab: (7,32,32). b_slab: (7,32,1). Returns (B, 3) f32."""
    B = x.shape[0]
    tile_b = max(LANE, min(_round_up(tile_b, LANE), 4096))

    pb0 = _round_up(B, LANE)                          # minimal lane-padded batch
    tb = min(tile_b, pb0)
    # v7x: if the batch spans >=2 lane tiles, guarantee >=2 grid steps so both
    # TensorCores (batch axis is "parallel") get work. No-op on v5e/v6e.
    if pb0 >= 2 * LANE:
        tb = min(tb, _round_up((pb0 + 1) // 2, LANE))

    padded_b = _round_up(B, tb)
    # Batch on the lane axis: pad features 19->32 and batch B->padded_b, transpose.
    xt = jnp.pad(x, ((0, padded_b - B), (0, FEAT_PAD - IN_DIM))).T  # (32, padded_b)
    grid = (padded_b // tb,)

    out = pl.pallas_call(
        mlp_kernel,
        out_shape=jax.ShapeDtypeStruct((FEAT_PAD, padded_b), jnp.float32),
        grid=grid,
        in_specs=[
            pl.BlockSpec((FEAT_PAD, tb), lambda i: (0, i)),                 # batch-tiled x^T
            pl.BlockSpec((NUM_LAYERS, FEAT_PAD, FEAT_PAD), lambda i: (0, 0, 0)),  # resident W^T
            pl.BlockSpec((NUM_LAYERS, FEAT_PAD, 1), lambda i: (0, 0, 0)),         # resident biases
        ],
        out_specs=pl.BlockSpec((FEAT_PAD, tb), lambda i: (0, i)),           # lane-dense output
        compiler_params=pltpu.CompilerParams(
            dimension_semantics=("parallel",),        # shard batch tiles across TCs
        ),
    )(xt, w_slab, b_slab)

    return out[:OUT_DIM, :B].T                        # (B, 3)


def init_params(key):
    """Deterministic init matching nn.Linear shapes (weights stored (in, out))."""
    params = []
    for i in range(NUM_LAYERS):
        fan_in, fan_out = DIMS[i], DIMS[i + 1]
        key, kw, kb = jax.random.split(key, 3)
        bound = 1.0 / jnp.sqrt(fan_in)
        w = jax.random.uniform(kw, (fan_in, fan_out), jnp.float32, -bound, bound)
        b = jax.random.uniform(kb, (fan_out,), jnp.float32, -bound, bound)
        params.append((w, b))
    return params


def reference_forward(x, params):
    h = x
    for i, (w, b) in enumerate(params):
        h = jnp.dot(h, w, precision=lax.Precision.HIGHEST) + b
        if i < len(params) - 1:
            h = jnp.maximum(h, 0.0)
    return h


if __name__ == "__main__":
    key = jax.random.PRNGKey(0)
    params = init_params(key)

    B = 64
    x = jax.random.normal(jax.random.PRNGKey(1), (B, IN_DIM), jnp.float32)
    ref = reference_forward(x, params)

    # Primary path: bf16 weight slab (MXU-native on v5e/v6e/v7x), f32 accumulation.
    wbf, bbf = pack_params(params, jnp.bfloat16)
    outbf = jax.block_until_ready(perceptron_forward(x, wbf, bbf))
    assert outbf.shape == (B, OUT_DIM)
    rel_err = jnp.max(jnp.abs(outbf - ref)) / (jnp.max(jnp.abs(ref)) + 1e-6)
    assert rel_err < 0.1, rel_err

    # Debug path: f32 weight slab; tolerance covers reduced-precision f32 dot lowering.
    w32, b32 = pack_params(params, jnp.float32)
    out32 = jax.block_until_ready(perceptron_forward(x, w32, b32))
    assert out32.shape == (B, OUT_DIM)
    assert jnp.allclose(out32, ref, atol=2e-3, rtol=2e-3)

    print("KERNEL_OK")
</pallas_src>

<mosaic_0001>
module attributes {stable_mosaic.version = 11 : i64} {
  func.func @mlp_kernel(%arg0: i32, %arg1: memref<32x128xf32, #tpu.memory_space<vmem>>, %arg2: memref<7x32x32xbf16, #tpu.memory_space<vmem>>, %arg3: memref<7x32x1xf32, #tpu.memory_space<vmem>>, %arg4: memref<32x128xf32, #tpu.memory_space<vmem>>) attributes {dimension_semantics = [#tpu.dimension_semantics<parallel>], iteration_bounds = array<i64: 1>, scalar_prefetch = 0 : i64, scratch_operands = 0 : i64, tpu.core_type = #tpu.core_type<tc>, window_params = [{transform_indices = @transform_0, window_bounds = array<i64: 32, 128>}, {pipeline_mode = #tpu.pipeline_mode<synchronous>, transform_indices = @transform_1, window_bounds = array<i64: 7, 32, 32>}, {pipeline_mode = #tpu.pipeline_mode<synchronous>, transform_indices = @transform_2, window_bounds = array<i64: 7, 32, 1>}, {transform_indices = @transform_3, window_bounds = array<i64: 32, 128>}]} {
    %c0 = arith.constant 0 : index
    %c0_0 = arith.constant 0 : index
    %c0_1 = arith.constant 0 : index
    %0 = vector.load %arg3[%c0, %c0_0, %c0_1] : memref<7x32x1xf32, #tpu.memory_space<vmem>>, vector<7x32x1xf32>
    %c0_2 = arith.constant 0 : index
    %c0_3 = arith.constant 0 : index
    %1 = vector.load %arg1[%c0_2, %c0_3] : memref<32x128xf32, #tpu.memory_space<vmem>>, vector<32x128xf32>
    %2 = arith.truncf %1 : vector<32x128xf32> to vector<32x128xbf16>
    %c0_4 = arith.constant 0 : index
    %c0_5 = arith.constant 0 : index
    %c0_6 = arith.constant 0 : index
    %3 = vector.load %arg2[%c0_4, %c0_5, %c0_6] : memref<7x32x32xbf16, #tpu.memory_space<vmem>>, vector<1x32x32xbf16>
    %4 = vector.shape_cast %3 : vector<1x32x32xbf16> to vector<32x32xbf16>
    %cst = arith.constant dense<0.000000e+00> : vector<32x128xf32>
    %5 = tpu.matmul %4, %2, %cst {dimension_numbers = #tpu.dot_dimension_numbers<[1], [0], [0], [1], [0, 0, 1, 1], [], []>} : vector<32x32xbf16>, vector<32x128xbf16>, vector<32x128xf32> -> vector<32x128xf32>
    %6 = vector.extract_strided_slice %0 {offsets = [0, 0, 0], sizes = [1, 32, 1], strides = [1, 1, 1]} : vector<7x32x1xf32> to vector<1x32x1xf32>
    %7 = vector.shape_cast %6 : vector<1x32x1xf32> to vector<32x1xf32>
    %8 = vector.broadcast %7 : vector<32x1xf32> to vector<32x128xf32>
    %9 = arith.addf %5, %8 : vector<32x128xf32>
    %cst_7 = arith.constant 0.000000e+00 : f32
    %10 = vector.broadcast %cst_7 : f32 to vector<32x128xf32>
    %11 = arith.maximumf %9, %10 : vector<32x128xf32>
    %12 = arith.truncf %11 : vector<32x128xf32> to vector<32x128xbf16>
    %c1 = arith.constant 1 : index
    %c0_8 = arith.constant 0 : index
    %c0_9 = arith.constant 0 : index
    %13 = vector.load %arg2[%c1, %c0_8, %c0_9] : memref<7x32x32xbf16, #tpu.memory_space<vmem>>, vector<1x32x32xbf16>
    %14 = vector.shape_cast %13 : vector<1x32x32xbf16> to vector<32x32xbf16>
    %cst_10 = arith.constant dense<0.000000e+00> : vector<32x128xf32>
    %15 = tpu.matmul %14, %12, %cst_10 {dimension_numbers = #tpu.dot_dimension_numbers<[1], [0], [0], [1], [0, 0, 1, 1], [], []>} : vector<32x32xbf16>, vector<32x128xbf16>, vector<32x128xf32> -> vector<32x128xf32>
    %16 = vector.extract_strided_slice %0 {offsets = [1, 0, 0], sizes = [1, 32, 1], strides = [1, 1, 1]} : vector<7x32x1xf32> to vector<1x32x1xf32>
    %17 = vector.shape_cast %16 : vector<1x32x1xf32> to vector<32x1xf32>
    %18 = vector.broadcast %17 : vector<32x1xf32> to vector<32x128xf32>
    %19 = arith.addf %15, %18 : vector<32x128xf32>
    %cst_11 = arith.constant 0.000000e+00 : f32
    %20 = vector.broadcast %cst_11 : f32 to vector<32x128xf32>
    %21 = arith.maximumf %19, %20 : vector<32x128xf32>
    %22 = arith.truncf %21 : vector<32x128xf32> to vector<32x128xbf16>
    %c2 = arith.constant 2 : index
    %c0_12 = arith.constant 0 : index
    %c0_13 = arith.constant 0 : index
    %23 = vector.load %arg2[%c2, %c0_12, %c0_13] : memref<7x32x32xbf16, #tpu.memory_space<vmem>>, vector<1x32x32xbf16>
    %24 = vector.shape_cast %23 : vector<1x32x32xbf16> to vector<32x32xbf16>
    %cst_14 = arith.constant dense<0.000000e+00> : vector<32x128xf32>
    %25 = tpu.matmul %24, %22, %cst_14 {dimension_numbers = #tpu.dot_dimension_numbers<[1], [0], [0], [1], [0, 0, 1, 1], [], []>} : vector<32x32xbf16>, vector<32x128xbf16>, vector<32x128xf32> -> vector<32x128xf32>
    %26 = vector.extract_strided_slice %0 {offsets = [2, 0, 0], sizes = [1, 32, 1], strides = [1, 1, 1]} : vector<7x32x1xf32> to vector<1x32x1xf32>
    %27 = vector.shape_cast %26 : vector<1x32x1xf32> to vector<32x1xf32>
    %28 = vector.broadcast %27 : vector<32x1xf32> to vector<32x128xf32>
    %29 = arith.addf %25, %28 : vector<32x128xf32>
    %cst_15 = arith.constant 0.000000e+00 : f32
    %30 = vector.broadcast %cst_15 : f32 to vector<32x128xf32>
    %31 = arith.maximumf %29, %30 : vector<32x128xf32>
    %32 = arith.truncf %31 : vector<32x128xf32> to vector<32x128xbf16>
    %c3 = arith.constant 3 : index
    %c0_16 = arith.constant 0 : index
    %c0_17 = arith.constant 0 : index
    %33 = vector.load %arg2[%c3, %c0_16, %c0_17] : memref<7x32x32xbf16, #tpu.memory_space<vmem>>, vector<1x32x32xbf16>
    %34 = vector.shape_cast %33 : vector<1x32x32xbf16> to vector<32x32xbf16>
    %cst_18 = arith.constant dense<0.000000e+00> : vector<32x128xf32>
    %35 = tpu.matmul %34, %32, %cst_18 {dimension_numbers = #tpu.dot_dimension_numbers<[1], [0], [0], [1], [0, 0, 1, 1], [], []>} : vector<32x32xbf16>, vector<32x128xbf16>, vector<32x128xf32> -> vector<32x128xf32>
    %36 = vector.extract_strided_slice %0 {offsets = [3, 0, 0], sizes = [1, 32, 1], strides = [1, 1, 1]} : vector<7x32x1xf32> to vector<1x32x1xf32>
    %37 = vector.shape_cast %36 : vector<1x32x1xf32> to vector<32x1xf32>
    %38 = vector.broadcast %37 : vector<32x1xf32> to vector<32x128xf32>
    %39 = arith.addf %35, %38 : vector<32x128xf32>
    %cst_19 = arith.constant 0.000000e+00 : f32
    %40 = vector.broadcast %cst_19 : f32 to vector<32x128xf32>
    %41 = arith.maximumf %39, %40 : vector<32x128xf32>
    %42 = arith.truncf %41 : vector<32x128xf32> to vector<32x128xbf16>
    %c4 = arith.constant 4 : index
    %c0_20 = arith.constant 0 : index
    %c0_21 = arith.constant 0 : index
    %43 = vector.load %arg2[%c4, %c0_20, %c0_21] : memref<7x32x32xbf16, #tpu.memory_space<vmem>>, vector<1x32x32xbf16>
    %44 = vector.shape_cast %43 : vector<1x32x32xbf16> to vector<32x32xbf16>
    %cst_22 = arith.constant dense<0.000000e+00> : vector<32x128xf32>
    %45 = tpu.matmul %44, %42, %cst_22 {dimension_numbers = #tpu.dot_dimension_numbers<[1], [0], [0], [1], [0, 0, 1, 1], [], []>} : vector<32x32xbf16>, vector<32x128xbf16>, vector<32x128xf32> -> vector<32x128xf32>
    %46 = vector.extract_strided_slice %0 {offsets = [4, 0, 0], sizes = [1, 32, 1], strides = [1, 1, 1]} : vector<7x32x1xf32> to vector<1x32x1xf32>
    %47 = vector.shape_cast %46 : vector<1x32x1xf32> to vector<32x1xf32>
    %48 = vector.broadcast %47 : vector<32x1xf32> to vector<32x128xf32>
    %49 = arith.addf %45, %48 : vector<32x128xf32>
    %cst_23 = arith.constant 0.000000e+00 : f32
    %50 = vector.broadcast %cst_23 : f32 to vector<32x128xf32>
    %51 = arith.maximumf %49, %50 : vector<32x128xf32>
    %52 = arith.truncf %51 : vector<32x128xf32> to vector<32x128xbf16>
    %c5 = arith.constant 5 : index
    %c0_24 = arith.constant 0 : index
    %c0_25 = arith.constant 0 : index
    %53 = vector.load %arg2[%c5, %c0_24, %c0_25] : memref<7x32x32xbf16, #tpu.memory_space<vmem>>, vector<1x32x32xbf16>
    %54 = vector.shape_cast %53 : vector<1x32x32xbf16> to vector<32x32xbf16>
    %cst_26 = arith.constant dense<0.000000e+00> : vector<32x128xf32>
    %55 = tpu.matmul %54, %52, %cst_26 {dimension_numbers = #tpu.dot_dimension_numbers<[1], [0], [0], [1], [0, 0, 1, 1], [], []>} : vector<32x32xbf16>, vector<32x128xbf16>, vector<32x128xf32> -> vector<32x128xf32>
    %56 = vector.extract_strided_slice %0 {offsets = [5, 0, 0], sizes = [1, 32, 1], strides = [1, 1, 1]} : vector<7x32x1xf32> to vector<1x32x1xf32>
    %57 = vector.shape_cast %56 : vector<1x32x1xf32> to vector<32x1xf32>
    %58 = vector.broadcast %57 : vector<32x1xf32> to vector<32x128xf32>
    %59 = arith.addf %55, %58 : vector<32x128xf32>
    %cst_27 = arith.constant 0.000000e+00 : f32
    %60 = vector.broadcast %cst_27 : f32 to vector<32x128xf32>
    %61 = arith.maximumf %59, %60 : vector<32x128xf32>
    %62 = arith.truncf %61 : vector<32x128xf32> to vector<32x128xbf16>
    %c6 = arith.constant 6 : index
    %c0_28 = arith.constant 0 : index
    %c0_29 = arith.constant 0 : index
    %63 = vector.load %arg2[%c6, %c0_28, %c0_29] : memref<7x32x32xbf16, #tpu.memory_space<vmem>>, vector<1x32x32xbf16>
    %64 = vector.shape_cast %63 : vector<1x32x32xbf16> to vector<32x32xbf16>
    %cst_30 = arith.constant dense<0.000000e+00> : vector<32x128xf32>
    %65 = tpu.matmul %64, %62, %cst_30 {dimension_numbers = #tpu.dot_dimension_numbers<[1], [0], [0], [1], [0, 0, 1, 1], [], []>} : vector<32x32xbf16>, vector<32x128xbf16>, vector<32x128xf32> -> vector<32x128xf32>
    %66 = vector.extract_strided_slice %0 {offsets = [6, 0, 0], sizes = [1, 32, 1], strides = [1, 1, 1]} : vector<7x32x1xf32> to vector<1x32x1xf32>
    %67 = vector.shape_cast %66 : vector<1x32x1xf32> to vector<32x1xf32>
    %68 = vector.broadcast %67 : vector<32x1xf32> to vector<32x128xf32>
    %69 = arith.addf %65, %68 : vector<32x128xf32>
    %c0_31 = arith.constant 0 : index
    %c0_32 = arith.constant 0 : index
    %70 = vector.load %arg4[%c0_31, %c0_32] : memref<32x128xf32, #tpu.memory_space<vmem>>, vector<32x128xf32>
    tpu.vector_store %arg4[%c0_31, %c0_32], %69 {strides = array<i32>} : memref<32x128xf32, #tpu.memory_space<vmem>>, vector<32x128xf32>,
    return
  }
  func.func @transform_0(%arg0: i32) -> (i32, i32) {
    %c0_i32 = arith.constant 0 : i32
    %c0_i32_0 = arith.constant 0 : i32
    return %c0_i32, %arg0 : i32, i32
  }
  func.func @transform_1(%arg0: i32) -> (i32, i32, i32) {
    %c0_i32 = arith.constant 0 : i32
    %c0_i32_0 = arith.constant 0 : i32
    %c0_i32_1 = arith.constant 0 : i32
    %c0_i32_2 = arith.constant 0 : i32
    return %c0_i32, %c0_i32_0, %c0_i32_1 : i32, i32, i32
  }
  func.func @transform_2(%arg0: i32) -> (i32, i32, i32) {
    %c0_i32 = arith.constant 0 : i32
    %c0_i32_0 = arith.constant 0 : i32
    %c0_i32_1 = arith.constant 0 : i32
    %c0_i32_2 = arith.constant 0 : i32
    return %c0_i32, %c0_i32_0, %c0_i32_1 : i32, i32, i32
  }
  func.func @transform_3(%arg0: i32) -> (i32, i32) {
    %c0_i32 = arith.constant 0 : i32
    %c0_i32_0 = arith.constant 0 : i32
    return %c0_i32, %arg0 : i32, i32
  }
}

</mosaic_0001>

<bundles_post_ra>
// kernel: tpu_custom_call.1
= control target key start
LH: loop header
LB: loop body
LE: loop exit
PB: predicated region body
PF: predicated region fallthrough
CT: control target
= control target key end

     0   :  { %v671_v3 = vmov 0   ;;  %s850_s0 = inlined_call_operand.vmem [shape: f32[32,128], index: 0, kind: input, shape index: {}]   ;;  %s851_s1 = inlined_call_operand.vmem [shape: bf16[7,32,32], index: 1, kind: input, shape index: {}]   ;;  %s852_s2 = inlined_call_operand.vmem [shape: f32[7,32,1], index: 2, kind: input, shape index: {}]   ;;  %s853_s3 = inlined_call_operand.hbm [shape: f32[32,128], index: 3, kind: output, shape index: {}]  }
   0x1   :  { %v18_v0 = vld [vmem:[%s852_s2 + $0x10] sm:$0xff]  ;;  %v16_v1 = vld [vmem:[%s852_s2] sm:$0xff]  ;;  %643 = vset.pattern.permute.xlu1 %v671_v3  ;;  %642 = vset.pattern.permute.xlu0 %v671_v3  ;;  %v47_v4 = vld [vmem:[%s850_s0 + $0x18] sm:$0xff] }
   0x2   :  { %v46_v2 = vld [vmem:[%s850_s0 + $0x10] sm:$0xff]  ;;  %v44_v5 = vld [vmem:[%s850_s0] sm:$0xff]  ;;  %v45_v6 = vld [vmem:[%s850_s0 + $0x8] sm:$0xff]  ;;  %66 = vperm.xlu0 %642, %v18_v0   ;;  %56 = vperm.xlu1 %643, %v16_v1  }
   0x3   :  { %v49_v7 = vpack.c.bf16 %v47_v4, %v46_v2  ;;  %644 = vset.pattern.permute.xlu2 %v671_v3  ;;  %v48_v8 = vpack.c.bf16 %v45_v6, %v44_v5 }
   0x5   :  { %636 = vmatpush.bf16.msra.mxu3 %v49_v7  ;;  %97 = vmatpush.bf16.msra.mxu0 %v49_v7 }
   0x6   :  { %8 = vsyncpa [#allocation3], 0  ;;  %v623_v9 = vld [vmem:[%s851_s1 + $0x8] sm:$0xff]  ;;  %v19_v10 = vld [vmem:[%s852_s2 + $0x18] sm:$0xff]  ;;  %vm84_vm0 = vcmask 261120   ;;  %s672_s19 = smov [#allocation2]  }
   0x7   :  { %v17_v11 = vld [vmem:[%s852_s2 + $0x8] sm:$0xff]  ;;  %v622_v12 = vld [vmem:[%s851_s1] sm:$0xff]  ;;  %v27_v15 = vld [vmem:[%s852_s2 + $0x58] sm:$0xff]  ;;  %s514_s20 = sshll.u32 %s672_s19, 4  ;;  %s673_s23 = smov 128   ;;  %s515_s20 = int_to_ptr.vmem [resolvable:$true] %s514_s20 }
   0x8   :  { %v20_v13 = vld [vmem:[%s852_s2 + $0x20] sm:$0xff]  ;;  %v21_v14 = vld [vmem:[%s852_s2 + $0x28] sm:$0xff]  ;;  %v30_v17 = vld [vmem:[%s852_s2 + $0x70] sm:$0xff]  ;;  %s674_s24 = smov 8  }
   0x9   :  { %637 = vmatpush.bf16.msra.mxu3 %v48_v8  ;;  %98 = vmatpush.bf16.msra.mxu0 %v48_v8  ;;  %v24_v16 = vld [vmem:[%s852_s2 + $0x40] sm:$0xff]  ;;  %v31_v18 = vld [vmem:[%s852_s2 + $0x78] sm:$0xff]  ;;  %v29_v19 = vld [vmem:[%s852_s2 + $0x68] sm:$0xff] }
   0xa   :  { %71 = vperm.xlu0 %642, %v19_v10   ;;  %61 = vperm.xlu1 %643, %v17_v11   ;;  %v34_v20 = vld [vmem:[%s852_s2 + $0x90] sm:$0xff]  ;;  %v32_v21 = vld [vmem:[%s852_s2 + $0x80] sm:$0xff]  ;;  %v33_v22 = vld [vmem:[%s852_s2 + $0x88] sm:$0xff] }
   0xb   :  { %v39_v23 = vld [vmem:[%s852_s2 + $0xb8] sm:$0xff]  ;;  %v36_v24 = vld [vmem:[%s852_s2 + $0xa0] sm:$0xff]  ;;  %v41_v26 = vld [vmem:[%s852_s2 + $0xc8] sm:$0xff] }
   0xc   :  { %537 = vmatmul.msk.bf16.vlgmr.msra.gmra.mxu3 %vm84_vm0, %v623_v9  ;;  %536 = vmatmul.msk.bf16.vlgmr.msra.gmra.mxu0 %vm84_vm0, %v622_v12  ;;  %v40_v25 = vld [vmem:[%s852_s2 + $0xc0] sm:$0xff]  ;;  %v43_v27 = vld [vmem:[%s852_s2 + $0xd8] sm:$0xff]  ;;  %v22_v28 = vld [vmem:[%s852_s2 + $0x30] sm:$0xff] }
   0xd   :  { %133 = vperm.xlu2 %644, %v22_v28   ;;  %v23_v29 = vld [vmem:[%s852_s2 + $0x38] sm:$0xff]  ;;  %v26_v30 = vld [vmem:[%s852_s2 + $0x50] sm:$0xff]  ;;  %v25_v34 = vld [vmem:[%s852_s2 + $0x48] sm:$0xff] }
   0xe   :  { %v28_v37 = vld [vmem:[%s852_s2 + $0x60] sm:$0xff]  ;;  %v35_v50 = vld [vmem:[%s852_s2 + $0x98] sm:$0xff]  ;;  %v624_v52 = vld [vmem:[%s851_s1 + $0x10] sm:$0xff] }
   0xf   :  { %v38_v53 = vld [vmem:[%s852_s2 + $0xb0] sm:$0xff]  ;;  %v37_v54 = vld [vmem:[%s852_s2 + $0xa8] sm:$0xff]  ;;  %v625_v55 = vld [vmem:[%s851_s1 + $0x18] sm:$0xff] }
  0x10   :  { %v42_v56 = vld [vmem:[%s852_s2 + $0xd0] sm:$0xff]  ;;  %v626_v11 = vld [vmem:[%s851_s1 + $0x20] sm:$0xff]  ;;  %v627_v12 = vld [vmem:[%s851_s1 + $0x28] sm:$0xff] }
  0x12   :  { %123 = vperm.xlu0 %642, %v20_v13   ;;  %128 = vperm.xlu1 %643, %v21_v14  }
  0x15   :  { %138 = vperm.xlu2 %644, %v23_v29  }
  0x1a   :  { %204 = vperm.xlu0 %642, %v27_v15   ;;  %189 = vperm.xlu1 %643, %v24_v16  }
  0x1d   :  { %199 = vperm.xlu2 %644, %v26_v30  }
  0x22   :  { %265 = vperm.xlu0 %642, %v30_v17   ;;  %270 = vperm.xlu1 %643, %v31_v18  }
  0x25   :  { %194 = vperm.xlu2 %644, %v25_v34  }
  0x2a   :  { %260 = vperm.xlu0 %642, %v29_v19   ;;  %331 = vperm.xlu1 %643, %v34_v20  }
  0x2d   :  { %255 = vperm.xlu2 %644, %v28_v37  }
  0x32   :  { %321 = vperm.xlu0 %642, %v32_v21   ;;  %326 = vperm.xlu1 %643, %v33_v22  }
  0x35   :  { %336 = vperm.xlu2 %644, %v35_v50  }
  0x3a   :  { %402 = vperm.xlu0 %642, %v39_v23   ;;  %387 = vperm.xlu1 %643, %v36_v24  }
  0x3d   :  { %397 = vperm.xlu2 %644, %v38_v53  }
  0x42   :  { %453 = vperm.xlu0 %642, %v40_v25   ;;  %458 = vperm.xlu1 %643, %v41_v26  }
  0x45   :  { %392 = vperm.xlu2 %644, %v37_v54  }
  0x4a   :  { %468 = vperm.xlu0 %642, %v43_v27  }
  0x4d   :  { %463 = vperm.xlu2 %644, %v42_v56  }
  0x67   :  { %v134_v59 = vpop.permute.xlu2 %133 }
  0x6f   :  { %v139_v63 = vpop.permute.xlu2 %138 }
  0x74   :  { %v67_v32 = vpop.permute.xlu0 %66  ;;  %v57_v33 = vpop.permute.xlu1 %56 }
  0x77   :  { %v200_v15 = vpop.permute.xlu2 %199 }
  0x7c   :  { %v72_v38 = vpop.permute.xlu0 %71  ;;  %v62_v40 = vpop.permute.xlu1 %61 }
  0x7f   :  { %v195_v19 = vpop.permute.xlu2 %194 }
  0x84   :  { %v129_v61 = vpop.permute.xlu1 %128  ;;  %v124_v3 = vpop.permute.xlu0 %123 }
  0x89   :  { %v100_v31 = vpop.f32.mrf.mxu0 }
  0x8a   :  { %v101_v42 = vadd.f32 %v100_v31, %v57_v33  ;;  %v628_v31 = vld [vmem:[%s851_s1 + $0x30] sm:$0xff] }
  0x8c   :  { %v110_v47 = vmax.f32 %v101_v42, 0.0  ;;  %v205_v17 = vpop.permute.xlu0 %204  ;;  %v190_v23 = vpop.permute.xlu1 %189 }
  0x8f   :  { %v105_v35 = vpop.f32.mrf.mxu3 }
  0x90   :  { %v106_v39 = vadd.f32 %v105_v35, %v67_v32  ;;  %v629_v32 = vld [vmem:[%s851_s1 + $0x38] sm:$0xff] }
  0x91   :  { %v102_v36 = vpop.f32.mrf.mxu0 }
  0x92   :  { %v103_v43 = vadd.f32 %v102_v36, %v62_v40  ;;  %v112_v45 = vmax.f32 %v106_v39, 0.0 }
  0x94   :  { %v111_v48 = vmax.f32 %v103_v43, 0.0  ;;  %v266_v35 = vpop.permute.xlu0 %265  ;;  %v271_v37 = vpop.permute.xlu1 %270 }
  0x95   :  { %v256_v43 = vpop.permute.xlu2 %255 }
  0x96   :  { %v114_v51 = vpack.c.bf16 %v111_v48, %v110_v47 }
  0x97   :  { %v107_v41 = vpop.f32.mrf.mxu3 }
  0x98   :  { %v108_v44 = vadd.f32 %v107_v41, %v72_v38 }
  0x9a   :  { %v113_v46 = vmax.f32 %v108_v44, 0.0 }
  0x9c   :  { %v115_v49 = vpack.c.bf16 %v113_v46, %v112_v45  ;;  %v261_v39 = vpop.permute.xlu0 %260 }
  0x9e   :  { %163 = vmatpush.bf16.msra.mxu1 %v115_v49 }
  0xa2   :  { %164 = vmatpush.bf16.msra.mxu1 %v114_v51  ;;  %v630_v51 = vld [vmem:[%s851_s1 + $0x40] sm:$0xff] }
  0xa5   :  { %550 = vmatmul.msk.bf16.vlgmr.msra.gmra.mxu1 %vm84_vm0, %v624_v52  ;;  %v631_v52 = vld [vmem:[%s851_s1 + $0x48] sm:$0xff] }
  0xb5   :  { %551 = vmatmul.msk.bf16.gmra.mxu1 %vm84_vm0, %v625_v55  ;;  %v332_v55 = vpop.permute.xlu1 %331 }
 0x122   :  { %v166_v57 = vpop.f32.mrf.mxu1 }
 0x123   :  { %v167_v4 = vadd.f32 %v166_v57, %v124_v3  ;;  %v327_v57 = vpop.permute.xlu1 %326 }
 0x125   :  { %v176_v9 = vmax.f32 %v167_v4, 0.0 }
 0x12a   :  { %v168_v58 = vpop.f32.mrf.mxu1 }
 0x12b   :  { %v169_v1 = vadd.f32 %v168_v58, %v129_v61 }
 0x12d   :  { %v177_v7 = vmax.f32 %v169_v1, 0.0 }
 0x12f   :  { %v180_v10 = vpack.c.bf16 %v177_v7, %v176_v9  ;;  %v632_v7 = vld [vmem:[%s851_s1 + $0x50] sm:$0xff] }
 0x132   :  { %v171_v60 = vpop.f32.mrf.mxu1 }
 0x133   :  { %v172_v62 = vadd.f32 %v171_v60, %v134_v59  ;;  %v337_v59 = vpop.permute.xlu2 %336 }
 0x135   :  { %v178_v5 = vmax.f32 %v172_v62, 0.0 }
 0x13a   :  { %v173_v0 = vpop.f32.mrf.mxu1 }
 0x13b   :  { %v174_v2 = vadd.f32 %v173_v0, %v139_v63  ;;  %v322_v63 = vpop.permute.xlu0 %321 }
 0x13d   :  { %v179_v6 = vmax.f32 %v174_v2, 0.0 }
 0x13f   :  { %v181_v8 = vpack.c.bf16 %v179_v6, %v178_v5 }
 0x141   :  { %229 = vmatpush.bf16.msra.mxu2 %v181_v8  ;;  %v633_v8 = vld [vmem:[%s851_s1 + $0x58] sm:$0xff] }
 0x145   :  { %230 = vmatpush.bf16.msra.mxu2 %v180_v10 }
 0x148   :  { %564 = vmatmul.msk.bf16.vlgmr.msra.gmra.mxu2 %vm84_vm0, %v626_v11  ;;  %v398_v11 = vpop.permute.xlu2 %397 }
 0x158   :  { %565 = vmatmul.msk.bf16.gmra.mxu2 %vm84_vm0, %v627_v12 }
 0x1cb   :  { %v232_v13 = vpop.f32.mrf.mxu2 }
 0x1cc   :  { %v233_v24 = vadd.f32 %v232_v13, %v190_v23  ;;  %v403_v13 = vpop.permute.xlu0 %402 }
 0x1ce   :  { %v242_v29 = vmax.f32 %v233_v24, 0.0 }
 0x1d3   :  { %v234_v14 = vpop.f32.mrf.mxu2 }
 0x1d4   :  { %v235_v21 = vadd.f32 %v234_v14, %v195_v19  ;;  %v388_v19 = vpop.permute.xlu1 %387 }
 0x1d6   :  { %v243_v27 = vmax.f32 %v235_v21, 0.0 }
 0x1d8   :  { %v246_v30 = vpack.c.bf16 %v243_v27, %v242_v29  ;;  %v634_v27 = vld [vmem:[%s851_s1 + $0x60] sm:$0xff]  ;;  %v454_v29 = vpop.permute.xlu0 %453 }
 0x1db   :  { %v237_v16 = vpop.f32.mrf.mxu2 }
 0x1dc   :  { %v238_v18 = vadd.f32 %v237_v16, %v200_v15  ;;  %v393_v15 = vpop.permute.xlu2 %392 }
 0x1de   :  { %v244_v25 = vmax.f32 %v238_v18, 0.0 }
 0x1e3   :  { %v239_v20 = vpop.f32.mrf.mxu2 }
 0x1e4   :  { %v240_v22 = vadd.f32 %v239_v20, %v205_v17 }
 0x1e6   :  { %v245_v26 = vmax.f32 %v240_v22, 0.0 }
 0x1e8   :  { %v247_v28 = vpack.c.bf16 %v245_v26, %v244_v25 }
 0x1ea   :  { %295 = vmatpush.bf16.msrb.mxu3 %v247_v28  ;;  %v635_v28 = vld [vmem:[%s851_s1 + $0x68] sm:$0xff]  ;;  %s516_s1 = sshll.u32 %s853_s3, 4  ;;  %s517_s1 = int_to_ptr.hbm [resolvable:$true] %s516_s1 }
 0x1ee   :  { %296 = vmatpush.bf16.msrb.mxu3 %v246_v30 }
 0x1f1   :  { %578 = vmatmul.msk.bf16.vlgmr.msrb.gmra.mxu3 %vm84_vm0, %v628_v31 }
 0x201   :  { %579 = vmatmul.msk.bf16.gmra.mxu3 %vm84_vm0, %v629_v32  ;;  %v459_v32 = vpop.permute.xlu1 %458 }
 0x274   :  { %v298_v33 = vpop.f32.mrf.mxu3 }
 0x275   :  { %v299_v44 = vadd.f32 %v298_v33, %v256_v43 }
 0x277   :  { %v308_v49 = vmax.f32 %v299_v44, 0.0 }
 0x27c   :  { %v300_v34 = vpop.f32.mrf.mxu3 }
 0x27d   :  { %v301_v41 = vadd.f32 %v300_v34, %v261_v39 }
 0x27f   :  { %v309_v47 = vmax.f32 %v301_v41, 0.0 }
 0x281   :  { %v312_v50 = vpack.c.bf16 %v309_v47, %v308_v49 }
 0x284   :  { %v303_v36 = vpop.f32.mrf.mxu3 }
 0x285   :  { %v304_v38 = vadd.f32 %v303_v36, %v266_v35  ;;  %v464_v35 = vpop.permute.xlu2 %463 }
 0x287   :  { %v310_v45 = vmax.f32 %v304_v38, 0.0  ;;  %v469_v38 = vpop.permute.xlu0 %468 }
 0x28c   :  { %v305_v40 = vpop.f32.mrf.mxu3 }
 0x28d   :  { %v306_v42 = vadd.f32 %v305_v40, %v271_v37 }
 0x28f   :  { %v311_v46 = vmax.f32 %v306_v42, 0.0 }
 0x291   :  { %v313_v48 = vpack.c.bf16 %v311_v46, %v310_v45 }
 0x293   :  { %361 = vmatpush.bf16.msrb.mxu0 %v313_v48 }
 0x297   :  { %362 = vmatpush.bf16.msrb.mxu0 %v312_v50 }
 0x29a   :  { %592 = vmatmul.msk.bf16.vlgmr.msrb.gmra.mxu0 %vm84_vm0, %v630_v51 }
 0x2aa   :  { %593 = vmatmul.msk.bf16.gmra.mxu0 %vm84_vm0, %v631_v52 }
 0x317   :  { %v364_v53 = vpop.f32.mrf.mxu0 }
 0x318   :  { %v365_v0 = vadd.f32 %v364_v53, %v322_v63 }
 0x31a   :  { %v374_v5 = vmax.f32 %v365_v0, 0.0 }
 0x31f   :  { %v366_v54 = vpop.f32.mrf.mxu0 }
 0x320   :  { %v367_v61 = vadd.f32 %v366_v54, %v327_v57 }
 0x322   :  { %v375_v3 = vmax.f32 %v367_v61, 0.0 }
 0x324   :  { %v378_v6 = vpack.c.bf16 %v375_v3, %v374_v5 }
 0x327   :  { %v369_v56 = vpop.f32.mrf.mxu0 }
 0x328   :  { %v370_v58 = vadd.f32 %v369_v56, %v332_v55 }
 0x32a   :  { %v376_v1 = vmax.f32 %v370_v58, 0.0 }
 0x32f   :  { %v371_v60 = vpop.f32.mrf.mxu0 }
 0x330   :  { %v372_v62 = vadd.f32 %v371_v60, %v337_v59 }
 0x332   :  { %v377_v2 = vmax.f32 %v372_v62, 0.0 }
 0x334   :  { %v379_v4 = vpack.c.bf16 %v377_v2, %v376_v1 }
 0x336   :  { %427 = vmatpush.bf16.msrb.mxu1 %v379_v4 }
 0x33a   :  { %428 = vmatpush.bf16.msrb.mxu1 %v378_v6 }
 0x33d   :  { %606 = vmatmul.msk.bf16.vlgmr.msrb.gmra.mxu1 %vm84_vm0, %v632_v7 }
 0x34d   :  { %607 = vmatmul.msk.bf16.gmra.mxu1 %vm84_vm0, %v633_v8 }
 0x3ba   :  { %v430_v9 = vpop.f32.mrf.mxu1 }
 0x3bb   :  { %v431_v20 = vadd.f32 %v430_v9, %v388_v19 }
 0x3bd   :  { %v440_v25 = vmax.f32 %v431_v20, 0.0 }
 0x3c2   :  { %v432_v10 = vpop.f32.mrf.mxu1 }
 0x3c3   :  { %v433_v17 = vadd.f32 %v432_v10, %v393_v15 }
 0x3c5   :  { %v441_v23 = vmax.f32 %v433_v17, 0.0 }
 0x3c7   :  { %v444_v26 = vpack.c.bf16 %v441_v23, %v440_v25 }
 0x3ca   :  { %v435_v12 = vpop.f32.mrf.mxu1 }
 0x3cb   :  { %v436_v14 = vadd.f32 %v435_v12, %v398_v11 }
 0x3cd   :  { %v442_v21 = vmax.f32 %v436_v14, 0.0 }
 0x3d2   :  { %v437_v16 = vpop.f32.mrf.mxu1 }
 0x3d3   :  { %v438_v18 = vadd.f32 %v437_v16, %v403_v13 }
 0x3d5   :  { %v443_v22 = vmax.f32 %v438_v18, 0.0 }
 0x3d7   :  { %v445_v24 = vpack.c.bf16 %v443_v22, %v442_v21 }
 0x3d9   :  { %493 = vmatpush.bf16.msrb.mxu2 %v445_v24 }
 0x3dd   :  { %494 = vmatpush.bf16.msrb.mxu2 %v444_v26 }
 0x3e0   :  { %620 = vmatmul.msk.bf16.vlgmr.msrb.gmra.mxu2 %vm84_vm0, %v634_v27 }
 0x3f0   :  { %621 = vmatmul.msk.bf16.gmra.mxu2 %vm84_vm0, %v635_v28 }
 0x463   :  { %v496_v30 = vpop.f32.mrf.mxu2 }
 0x464   :  { %v497_v31 = vadd.f32 %v496_v30, %v454_v29 }
 0x466   :  { %506 = vst [vmem:[#allocation2] sm:$0xff] %v497_v31 }
 0x46b   :  { %v498_v33 = vpop.f32.mrf.mxu2 }
 0x46c   :  { %v499_v34 = vadd.f32 %v498_v33, %v459_v32 }
 0x46e   :  { %507 = vst [vmem:[#allocation2 + $0x8] sm:$0xff] %v499_v34 }
 0x473   :  { %v501_v36 = vpop.f32.mrf.mxu2 }
 0x474   :  { %v502_v37 = vadd.f32 %v501_v36, %v464_v35 }
 0x476   :  { %508 = vst [vmem:[#allocation2 + $0x10] sm:$0xff] %v502_v37 }
 0x47b   :  { %v503_v39 = vpop.f32.mrf.mxu2 }
 0x47c   :  { %v504_v40 = vadd.f32 %v503_v39, %v469_v38 }
 0x47e   :  { %509 = vst [vmem:[#allocation2 + $0x18] sm:$0xff] %v504_v40 }
 0x47f   :  { %522 = dma.vmem_to_hbm [thread:$0]  %s515_s20, 512, %s517_s1, [#allocation3], %s673_s23, %s673_s23, %s674_s24  }
 0x480   :  { %669 = dma.done.wait [#allocation3], 512  }
 0x481   :  { %670 = vsyncadd [#allocation3], 4294966784 }
 0x482   :  { %527 = vsyncpa [#allocation3], 1 }

</bundles_post_ra>
